<compile_context>
chip_gen: v7x
topology: tpu7x:2x2x1
jax: 0.10.0
libtpu: 0.0.40
codegen_flags: <defaults>
</compile_context>

<pallas_src>
import functools

import jax
import jax.numpy as jnp
import numpy as np
from jax.experimental import pallas as pl
from jax.experimental.pallas import tpu as pltpu


# ---------------------------------------------------------------------------
# Kernels
# ---------------------------------------------------------------------------

def _conv_block_kernel(x_ref, w_ref, b_ref, o_ref, *, stride, hp, wp, cin, cout,
                       normalize, leaky, eps=1e-5):
    """One Conv2d(3x3, pad=1, stride) [+ InstanceNorm2d] [+ LeakyReLU(0.2)].

    x_ref: (stride*stride, Hq, Wq, cin)  bf16 phase tensor (one sample)
    w_ref: (9*cin, cout)                 bf16 packed weight, row order (kh,kw,cin)
    b_ref: (1, cout)                     f32 bias
    o_ref: (1, hp*wp, cout)              output (spatial flattened)
    """
    s = stride
    acc = jnp.zeros((hp * wp, cout), jnp.float32)
    # 9 shifted-tap matmuls, accumulated in f32 (conv-as-matmul, no im2col).
    for kh in range(3):
        for kw in range(3):
            p = (kh % s) * s + (kw % s)          # phase of this tap
            oh, ow = kh // s, kw // s            # offset inside the phase image
            tap = x_ref[p, oh:oh + hp, ow:ow + wp, :].reshape(hp * wp, cin)
            wt = w_ref[(kh * 3 + kw) * cin:(kh * 3 + kw + 1) * cin, :]
            acc = acc + jnp.dot(tap, wt, preferred_element_type=jnp.float32)
    y = acc + b_ref[...]
    if normalize:
        # InstanceNorm2d (affine=False, biased variance) over spatial per channel.
        # Full spatial extent of this sample lives in this block.
        mean = jnp.mean(y, axis=0, keepdims=True)
        var = jnp.mean(jnp.square(y - mean), axis=0, keepdims=True)
        y = (y - mean) * jax.lax.rsqrt(var + eps)
    if leaky:
        y = jnp.where(y > 0.0, y, 0.2 * y)
    o_ref[0] = y.astype(o_ref.dtype)


def _tail_kernel(x_ref, wa_ref, ba_ref, wb_ref, bb_ref, o_ref, pad_ref, *,
                 hp, wp, cin, cmid, cout, eps=1e-5):
    """Fused tail: Conv(256->512,s=1)+IN+LeakyReLU, then Conv(512->cout,s=1).

    x_ref:   (1, hp+2, wp+2, cin)   bf16 zero-padded input (one sample)
    wa_ref:  (9*cin, cmid) bf16     ba_ref: (1, cmid) f32
    wb_ref:  (9*cmid, cout) bf16    bb_ref: (1, cout) f32   (cout lane-padded)
    o_ref:   (1, hp*wp, cout)       f32 output
    pad_ref: (hp+2, wp+2, cmid)     f32 VMEM halo scratch for the 2nd conv
    """
    # ---- conv A (stride 1) + InstanceNorm + LeakyReLU -----------------------
    acc = jnp.zeros((hp * wp, cmid), jnp.float32)
    for kh in range(3):
        for kw in range(3):
            tap = x_ref[0, kh:kh + hp, kw:kw + wp, :].reshape(hp * wp, cin)
            wt = wa_ref[(kh * 3 + kw) * cin:(kh * 3 + kw + 1) * cin, :]
            acc = acc + jnp.dot(tap, wt, preferred_element_type=jnp.float32)
    y = acc + ba_ref[...]
    mean = jnp.mean(y, axis=0, keepdims=True)
    var = jnp.mean(jnp.square(y - mean), axis=0, keepdims=True)
    y = (y - mean) * jax.lax.rsqrt(var + eps)
    y = jnp.where(y > 0.0, y, 0.2 * y)

    # ---- halo-pad the intermediate into VMEM scratch (no HBM round-trip) ----
    pad_ref[...] = jnp.zeros_like(pad_ref)
    pad_ref[1:hp + 1, 1:wp + 1, :] = y.reshape(hp, wp, cmid).astype(pad_ref.dtype)

    # ---- conv B (stride 1, final projection, no norm / activation) ----------
    acc2 = jnp.zeros((hp * wp, cout), jnp.float32)
    for kh in range(3):
        for kw in range(3):
            tap = pad_ref[kh:kh + hp, kw:kw + wp, :].reshape(hp * wp, cmid)
            tap = tap.astype(jnp.bfloat16)
            wt = wb_ref[(kh * 3 + kw) * cmid:(kh * 3 + kw + 1) * cmid, :]
            acc2 = acc2 + jnp.dot(tap, wt, preferred_element_type=jnp.float32)
    o_ref[0] = (acc2 + bb_ref[...]).astype(o_ref.dtype)


# ---------------------------------------------------------------------------
# Wrappers (glue only: pad / space-to-depth / weight packing)
# ---------------------------------------------------------------------------

def make_phase_tensor(x_nhwc, stride):
    """pad=1 then space-to-depth by `stride`.

    Returns (N*stride*stride, Hq, Wq, C) so every 3x3 tap becomes a contiguous
    static slice of one phase image inside the kernel.
    """
    N, H, W, C = x_nhwc.shape
    s = stride
    Hp = (H + 2 - 3) // s + 1
    Wp = (W + 2 - 3) // s + 1
    Hq = -(-(H + 2) // s)
    Wq = -(-(W + 2) // s)
    xp = jnp.pad(x_nhwc, ((0, 0), (1, Hq * s - H - 1), (1, Wq * s - W - 1), (0, 0)))
    xph = xp.reshape(N, Hq, s, Wq, s, C)
    xph = jnp.transpose(xph, (0, 2, 4, 1, 3, 5)).reshape(N * s * s, Hq, Wq, C)
    return xph, Hp, Wp, Hq, Wq


def pack_weight(w_oihw, cin_pad=None, cout_pad=None):
    """OIHW -> (9*cin, cout) bf16, row order (kh, kw, cin); optional zero-pads."""
    cout, cin, _, _ = w_oihw.shape
    w = jnp.transpose(w_oihw, (2, 3, 1, 0))      # (3, 3, cin, cout)
    if cin_pad is not None and cin_pad > cin:
        w = jnp.pad(w, ((0, 0), (0, 0), (0, cin_pad - cin), (0, 0)))
        cin = cin_pad
    if cout_pad is not None and cout_pad > cout:
        w = jnp.pad(w, ((0, 0), (0, 0), (0, 0), (0, cout_pad - cout)))
        cout = cout_pad
    return w.reshape(9 * cin, cout).astype(jnp.bfloat16)


def conv_block_pallas(x_nhwc, w_packed, bias, *, stride, normalize, leaky,
                      out_dtype=jnp.bfloat16):
    N, H, W, C = x_nhwc.shape
    cout = w_packed.shape[1]
    assert w_packed.shape[0] == 9 * C
    s = stride
    xph, Hp, Wp, Hq, Wq = make_phase_tensor(x_nhwc.astype(jnp.bfloat16), s)
    kernel = functools.partial(_conv_block_kernel, stride=s, hp=Hp, wp=Wp,
                               cin=C, cout=cout, normalize=normalize, leaky=leaky)
    y = pl.pallas_call(
        kernel,
        out_shape=jax.ShapeDtypeStruct((N, Hp * Wp, cout), out_dtype),
        grid_spec=pltpu.PrefetchScalarGridSpec(
            num_scalar_prefetch=0,
            grid=(N,),
            in_specs=[
                pl.BlockSpec((s * s, Hq, Wq, C), lambda n: (n, 0, 0, 0)),
                pl.BlockSpec((9 * C, cout), lambda n: (0, 0)),
                pl.BlockSpec((1, cout), lambda n: (0, 0)),
            ],
            out_specs=pl.BlockSpec((1, Hp * Wp, cout), lambda n: (n, 0, 0)),
        ),
        compiler_params=pltpu.CompilerParams(
            dimension_semantics=("parallel",),
        ),
    )(xph, w_packed, bias.reshape(1, cout).astype(jnp.float32))
    return y.reshape(N, Hp, Wp, cout)


def tail_block_pallas(x_nhwc, wa_packed, ba, wb_packed, bb):
    """Fused final two stride-1 layers: Conv+IN+LeakyReLU then Conv (padded Cout)."""
    N, H, W, C = x_nhwc.shape
    cmid = wa_packed.shape[1]
    cout = wb_packed.shape[1]
    xp = jnp.pad(x_nhwc.astype(jnp.bfloat16), ((0, 0), (1, 1), (1, 1), (0, 0)))
    kernel = functools.partial(_tail_kernel, hp=H, wp=W, cin=C, cmid=cmid, cout=cout)
    y = pl.pallas_call(
        kernel,
        out_shape=jax.ShapeDtypeStruct((N, H * W, cout), jnp.float32),
        grid_spec=pltpu.PrefetchScalarGridSpec(
            num_scalar_prefetch=0,
            grid=(N,),
            in_specs=[
                pl.BlockSpec((1, H + 2, W + 2, C), lambda n: (n, 0, 0, 0)),
                pl.BlockSpec((9 * C, cmid), lambda n: (0, 0)),
                pl.BlockSpec((1, cmid), lambda n: (0, 0)),
                pl.BlockSpec((9 * cmid, cout), lambda n: (0, 0)),
                pl.BlockSpec((1, cout), lambda n: (0, 0)),
            ],
            out_specs=pl.BlockSpec((1, H * W, cout), lambda n: (n, 0, 0)),
            scratch_shapes=[pltpu.VMEM((H + 2, W + 2, cmid), jnp.float32)],
        ),
        compiler_params=pltpu.CompilerParams(
            dimension_semantics=("parallel",),
        ),
    )(xp, wa_packed, ba.reshape(1, cmid).astype(jnp.float32),
      wb_packed, bb.reshape(1, cout).astype(jnp.float32))
    return y.reshape(N, H, W, cout)


# ---------------------------------------------------------------------------
# Model
# ---------------------------------------------------------------------------

def init_params(key, channels=1):
    """Deterministic synthetic params matching the PyTorch layer shapes."""
    # (cin, cout, stride, instance_norm, leaky_relu)
    cfgs = [
        (channels, 64, 2, False, True),
        (64, 128, 2, True, True),
        (128, 256, 2, True, True),
        (256, 512, 1, True, True),
        (512, 1, 1, False, False),   # final Conv2d(512, 1, 3, 1, 1)
    ]
    params = []
    for (cin, cout, stride, normalize, leaky) in cfgs:
        key, k1, k2 = jax.random.split(key, 3)
        bound = 1.0 / np.sqrt(cin * 9)
        w = jax.random.uniform(k1, (cout, cin, 3, 3), jnp.float32, -bound, bound)
        b = jax.random.uniform(k2, (cout,), jnp.float32, -bound, bound)
        params.append((w, b, stride, normalize, leaky))
    return params


def discriminator_forward(img_nchw, params):
    """Pallas implementation. Input NCHW (PyTorch convention), output NCHW."""
    x = jnp.transpose(img_nchw, (0, 2, 3, 1)).astype(jnp.float32)  # NHWC

    (w0, b0, s0, n0, l0) = params[0]
    (w1, b1, s1, n1, l1) = params[1]
    (w2, b2, s2, n2, l2) = params[2]
    (w3, b3, s3, n3, l3) = params[3]
    (w4, b4, s4, n4, l4) = params[4]

    # Pack weights once (bf16).  Layer-1 Cin padded to >=8 (degenerate K fix),
    # final Cout padded to 128 (lane-dense output stores).
    cin0 = w0.shape[1]
    cin0_pad = max(cin0, 8)
    w0p = pack_weight(w0, cin_pad=cin0_pad)
    w1p = pack_weight(w1)
    w2p = pack_weight(w2)
    w3p = pack_weight(w3)
    cout_pad = 128
    w4p = pack_weight(w4, cout_pad=cout_pad)
    b4p = jnp.pad(b4, (0, cout_pad - b4.shape[0]))

    if cin0_pad > cin0:
        x = jnp.pad(x, ((0, 0), (0, 0), (0, 0), (0, cin0_pad - cin0)))

    x = conv_block_pallas(x, w0p, b0, stride=s0, normalize=n0, leaky=l0)
    x = conv_block_pallas(x, w1p, b1, stride=s1, normalize=n1, leaky=l1)
    x = conv_block_pallas(x, w2p, b2, stride=s2, normalize=n2, leaky=l2)
    # Layers 4+5 fused in one kernel (both stride 1); slice back real channel 0.
    y = tail_block_pallas(x, w3p, b3, w4p, b4p)
    y = y[..., :w4.shape[0]]                       # (N, H, W, 1)
    return jnp.transpose(y, (0, 3, 1, 2))          # back to NCHW


def reference_forward(img_nchw, params):
    """Pure-JAX reference (lax.conv) with the same bf16-input / f32-accum policy."""
    x = img_nchw.astype(jnp.float32)
    for (w, b, stride, normalize, leaky) in params:
        x = jax.lax.conv_general_dilated(
            x.astype(jnp.bfloat16), w.astype(jnp.bfloat16),
            window_strides=(stride, stride), padding=((1, 1), (1, 1)),
            dimension_numbers=("NCHW", "OIHW", "NCHW"),
            preferred_element_type=jnp.float32)
        x = x + b.reshape(1, -1, 1, 1)
        if normalize:
            mean = jnp.mean(x, axis=(2, 3), keepdims=True)
            var = jnp.mean(jnp.square(x - mean), axis=(2, 3), keepdims=True)
            x = (x - mean) * jax.lax.rsqrt(var + 1e-5)
        if leaky:
            x = jnp.where(x > 0, x, 0.2 * x)
    return x


if __name__ == "__main__":
    key = jax.random.PRNGKey(0)
    key, pkey, xkey = jax.random.split(key, 3)

    channels = 1
    img = jax.random.normal(xkey, (2, channels, 16, 16), dtype=jnp.float32)

    params = init_params(pkey, channels=channels)

    out = jax.block_until_ready(discriminator_forward(img, params))
    ref = jax.block_until_ready(reference_forward(img, params))

    np.testing.assert_allclose(np.asarray(out), np.asarray(ref), rtol=2e-2, atol=2e-2)
    assert out.shape == (2, 1, 2, 2), out.shape

    print("KERNEL_OK")
</pallas_src>

<mosaic_0001>
module attributes {stable_mosaic.version = 11 : i64} {
  func.func @_conv_block_kernel(%arg0: i32, %arg1: memref<4x9x9x8xbf16, #tpu.memory_space<vmem>>, %arg2: memref<72x64xbf16, #tpu.memory_space<vmem>>, %arg3: memref<1x64xf32, #tpu.memory_space<vmem>>, %arg4: memref<1x64x64xbf16, #tpu.memory_space<vmem>>) attributes {dimension_semantics = [#tpu.dimension_semantics<parallel>], iteration_bounds = array<i64: 2>, scalar_prefetch = 0 : i64, scratch_operands = 0 : i64, tpu.core_type = #tpu.core_type<tc>, window_params = [{transform_indices = @transform_0, window_bounds = array<i64: 4, 9, 9, 8>}, {pipeline_mode = #tpu.pipeline_mode<synchronous>, transform_indices = @transform_1, window_bounds = array<i64: 72, 64>}, {pipeline_mode = #tpu.pipeline_mode<synchronous>, transform_indices = @transform_2, window_bounds = array<i64: 1, 64>}, {transform_indices = @transform_3, window_bounds = array<i64: 1, 64, 64>}]} {
    %cst = arith.constant 0.000000e+00 : f32
    %0 = vector.broadcast %cst : f32 to vector<64x64xf32>
    %c0 = arith.constant 0 : index
    %c0_0 = arith.constant 0 : index
    %c0_1 = arith.constant 0 : index
    %c0_2 = arith.constant 0 : index
    %1 = vector.load %arg1[%c0, %c0_0, %c0_1, %c0_2] : memref<4x9x9x8xbf16, #tpu.memory_space<vmem>>, vector<1x8x8x8xbf16>
    %2 = vector.shape_cast %1 : vector<1x8x8x8xbf16> to vector<8x8x8xbf16>
    %3 = vector.shape_cast %2 : vector<8x8x8xbf16> to vector<64x8xbf16>
    %c0_3 = arith.constant 0 : index
    %c0_4 = arith.constant 0 : index
    %4 = vector.load %arg2[%c0_3, %c0_4] : memref<72x64xbf16, #tpu.memory_space<vmem>>, vector<8x64xbf16>
    %cst_5 = arith.constant dense<0.000000e+00> : vector<64x64xf32>
    %5 = tpu.matmul %3, %4, %cst_5 {dimension_numbers = #tpu.dot_dimension_numbers<[1], [0], [0], [1], [0, 0, 1, 1], [], []>} : vector<64x8xbf16>, vector<8x64xbf16>, vector<64x64xf32> -> vector<64x64xf32>
    %6 = arith.addf %0, %5 : vector<64x64xf32>
    %c1 = arith.constant 1 : index
    %c0_6 = arith.constant 0 : index
    %c0_7 = arith.constant 0 : index
    %c0_8 = arith.constant 0 : index
    %7 = vector.load %arg1[%c1, %c0_6, %c0_7, %c0_8] : memref<4x9x9x8xbf16, #tpu.memory_space<vmem>>, vector<1x8x8x8xbf16>
    %8 = vector.shape_cast %7 : vector<1x8x8x8xbf16> to vector<8x8x8xbf16>
    %9 = vector.shape_cast %8 : vector<8x8x8xbf16> to vector<64x8xbf16>
    %c8 = arith.constant 8 : index
    %c0_9 = arith.constant 0 : index
    %10 = vector.load %arg2[%c8, %c0_9] : memref<72x64xbf16, #tpu.memory_space<vmem>>, vector<8x64xbf16>
    %cst_10 = arith.constant dense<0.000000e+00> : vector<64x64xf32>
    %11 = tpu.matmul %9, %10, %cst_10 {dimension_numbers = #tpu.dot_dimension_numbers<[1], [0], [0], [1], [0, 0, 1, 1], [], []>} : vector<64x8xbf16>, vector<8x64xbf16>, vector<64x64xf32> -> vector<64x64xf32>
    %12 = arith.addf %6, %11 : vector<64x64xf32>
    %c0_11 = arith.constant 0 : index
    %c0_12 = arith.constant 0 : index
    %c1_13 = arith.constant 1 : index
    %c0_14 = arith.constant 0 : index
    %13 = vector.load %arg1[%c0_11, %c0_12, %c1_13, %c0_14] : memref<4x9x9x8xbf16, #tpu.memory_space<vmem>>, vector<1x8x8x8xbf16>
    %14 = vector.shape_cast %13 : vector<1x8x8x8xbf16> to vector<8x8x8xbf16>
    %15 = vector.shape_cast %14 : vector<8x8x8xbf16> to vector<64x8xbf16>
    %c16 = arith.constant 16 : index
    %c0_15 = arith.constant 0 : index
    %16 = vector.load %arg2[%c16, %c0_15] : memref<72x64xbf16, #tpu.memory_space<vmem>>, vector<8x64xbf16>
    %cst_16 = arith.constant dense<0.000000e+00> : vector<64x64xf32>
    %17 = tpu.matmul %15, %16, %cst_16 {dimension_numbers = #tpu.dot_dimension_numbers<[1], [0], [0], [1], [0, 0, 1, 1], [], []>} : vector<64x8xbf16>, vector<8x64xbf16>, vector<64x64xf32> -> vector<64x64xf32>
    %18 = arith.addf %12, %17 : vector<64x64xf32>
    %c2 = arith.constant 2 : index
    %c0_17 = arith.constant 0 : index
    %c0_18 = arith.constant 0 : index
    %c0_19 = arith.constant 0 : index
    %19 = vector.load %arg1[%c2, %c0_17, %c0_18, %c0_19] : memref<4x9x9x8xbf16, #tpu.memory_space<vmem>>, vector<1x8x8x8xbf16>
    %20 = vector.shape_cast %19 : vector<1x8x8x8xbf16> to vector<8x8x8xbf16>
    %21 = vector.shape_cast %20 : vector<8x8x8xbf16> to vector<64x8xbf16>
    %c24 = arith.constant 24 : index
    %c0_20 = arith.constant 0 : index
    %22 = vector.load %arg2[%c24, %c0_20] : memref<72x64xbf16, #tpu.memory_space<vmem>>, vector<8x64xbf16>
    %cst_21 = arith.constant dense<0.000000e+00> : vector<64x64xf32>
    %23 = tpu.matmul %21, %22, %cst_21 {dimension_numbers = #tpu.dot_dimension_numbers<[1], [0], [0], [1], [0, 0, 1, 1], [], []>} : vector<64x8xbf16>, vector<8x64xbf16>, vector<64x64xf32> -> vector<64x64xf32>
    %24 = arith.addf %18, %23 : vector<64x64xf32>
    %c3 = arith.constant 3 : index
    %c0_22 = arith.constant 0 : index
    %c0_23 = arith.constant 0 : index
    %c0_24 = arith.constant 0 : index
    %25 = vector.load %arg1[%c3, %c0_22, %c0_23, %c0_24] : memref<4x9x9x8xbf16, #tpu.memory_space<vmem>>, vector<1x8x8x8xbf16>
    %26 = vector.shape_cast %25 : vector<1x8x8x8xbf16> to vector<8x8x8xbf16>
    %27 = vector.shape_cast %26 : vector<8x8x8xbf16> to vector<64x8xbf16>
    %c32 = arith.constant 32 : index
    %c0_25 = arith.constant 0 : index
    %28 = vector.load %arg2[%c32, %c0_25] : memref<72x64xbf16, #tpu.memory_space<vmem>>, vector<8x64xbf16>
    %cst_26 = arith.constant dense<0.000000e+00> : vector<64x64xf32>
    %29 = tpu.matmul %27, %28, %cst_26 {dimension_numbers = #tpu.dot_dimension_numbers<[1], [0], [0], [1], [0, 0, 1, 1], [], []>} : vector<64x8xbf16>, vector<8x64xbf16>, vector<64x64xf32> -> vector<64x64xf32>
    %30 = arith.addf %24, %29 : vector<64x64xf32>
    %c2_27 = arith.constant 2 : index
    %c0_28 = arith.constant 0 : index
    %c1_29 = arith.constant 1 : index
    %c0_30 = arith.constant 0 : index
    %31 = vector.load %arg1[%c2_27, %c0_28, %c1_29, %c0_30] : memref<4x9x9x8xbf16, #tpu.memory_space<vmem>>, vector<1x8x8x8xbf16>
    %32 = vector.shape_cast %31 : vector<1x8x8x8xbf16> to vector<8x8x8xbf16>
    %33 = vector.shape_cast %32 : vector<8x8x8xbf16> to vector<64x8xbf16>
    %c40 = arith.constant 40 : index
    %c0_31 = arith.constant 0 : index
    %34 = vector.load %arg2[%c40, %c0_31] : memref<72x64xbf16, #tpu.memory_space<vmem>>, vector<8x64xbf16>
    %cst_32 = arith.constant dense<0.000000e+00> : vector<64x64xf32>
    %35 = tpu.matmul %33, %34, %cst_32 {dimension_numbers = #tpu.dot_dimension_numbers<[1], [0], [0], [1], [0, 0, 1, 1], [], []>} : vector<64x8xbf16>, vector<8x64xbf16>, vector<64x64xf32> -> vector<64x64xf32>
    %36 = arith.addf %30, %35 : vector<64x64xf32>
    %c0_33 = arith.constant 0 : index
    %c1_34 = arith.constant 1 : index
    %c0_35 = arith.constant 0 : index
    %c0_36 = arith.constant 0 : index
    %37 = vector.load %arg1[%c0_33, %c1_34, %c0_35, %c0_36] : memref<4x9x9x8xbf16, #tpu.memory_space<vmem>>, vector<1x8x8x8xbf16>
    %38 = vector.shape_cast %37 : vector<1x8x8x8xbf16> to vector<8x8x8xbf16>
    %39 = vector.shape_cast %38 : vector<8x8x8xbf16> to vector<64x8xbf16>
    %c48 = arith.constant 48 : index
    %c0_37 = arith.constant 0 : index
    %40 = vector.load %arg2[%c48, %c0_37] : memref<72x64xbf16, #tpu.memory_space<vmem>>, vector<8x64xbf16>
    %cst_38 = arith.constant dense<0.000000e+00> : vector<64x64xf32>
    %41 = tpu.matmul %39, %40, %cst_38 {dimension_numbers = #tpu.dot_dimension_numbers<[1], [0], [0], [1], [0, 0, 1, 1], [], []>} : vector<64x8xbf16>, vector<8x64xbf16>, vector<64x64xf32> -> vector<64x64xf32>
    %42 = arith.addf %36, %41 : vector<64x64xf32>
    %c1_39 = arith.constant 1 : index
    %c1_40 = arith.constant 1 : index
    %c0_41 = arith.constant 0 : index
    %c0_42 = arith.constant 0 : index
    %43 = vector.load %arg1[%c1_39, %c1_40, %c0_41, %c0_42] : memref<4x9x9x8xbf16, #tpu.memory_space<vmem>>, vector<1x8x8x8xbf16>
    %44 = vector.shape_cast %43 : vector<1x8x8x8xbf16> to vector<8x8x8xbf16>
    %45 = vector.shape_cast %44 : vector<8x8x8xbf16> to vector<64x8xbf16>
    %c56 = arith.constant 56 : index
    %c0_43 = arith.constant 0 : index
    %46 = vector.load %arg2[%c56, %c0_43] : memref<72x64xbf16, #tpu.memory_space<vmem>>, vector<8x64xbf16>
    %cst_44 = arith.constant dense<0.000000e+00> : vector<64x64xf32>
    %47 = tpu.matmul %45, %46, %cst_44 {dimension_numbers = #tpu.dot_dimension_numbers<[1], [0], [0], [1], [0, 0, 1, 1], [], []>} : vector<64x8xbf16>, vector<8x64xbf16>, vector<64x64xf32> -> vector<64x64xf32>
    %48 = arith.addf %42, %47 : vector<64x64xf32>
    %c0_45 = arith.constant 0 : index
    %c1_46 = arith.constant 1 : index
    %c1_47 = arith.constant 1 : index
    %c0_48 = arith.constant 0 : index
    %49 = vector.load %arg1[%c0_45, %c1_46, %c1_47, %c0_48] : memref<4x9x9x8xbf16, #tpu.memory_space<vmem>>, vector<1x8x8x8xbf16>
    %50 = vector.shape_cast %49 : vector<1x8x8x8xbf16> to vector<8x8x8xbf16>
    %51 = vector.shape_cast %50 : vector<8x8x8xbf16> to vector<64x8xbf16>
    %c64 = arith.constant 64 : index
    %c0_49 = arith.constant 0 : index
    %52 = vector.load %arg2[%c64, %c0_49] : memref<72x64xbf16, #tpu.memory_space<vmem>>, vector<8x64xbf16>
    %cst_50 = arith.constant dense<0.000000e+00> : vector<64x64xf32>
    %53 = tpu.matmul %51, %52, %cst_50 {dimension_numbers = #tpu.dot_dimension_numbers<[1], [0], [0], [1], [0, 0, 1, 1], [], []>} : vector<64x8xbf16>, vector<8x64xbf16>, vector<64x64xf32> -> vector<64x64xf32>
    %54 = arith.addf %48, %53 : vector<64x64xf32>
    %c0_51 = arith.constant 0 : index
    %c0_52 = arith.constant 0 : index
    %55 = vector.load %arg3[%c0_51, %c0_52] : memref<1x64xf32, #tpu.memory_space<vmem>>, vector<1x64xf32>
    %56 = vector.broadcast %55 : vector<1x64xf32> to vector<64x64xf32>
    %57 = arith.addf %54, %56 : vector<64x64xf32>
    %cst_53 = arith.constant 0.000000e+00 : f32
    %58 = vector.broadcast %cst_53 : f32 to vector<64x64xf32>
    %59 = arith.cmpf ogt, %57, %58 : vector<64x64xf32>
    %cst_54 = arith.constant 2.000000e-01 : f32
    %60 = vector.broadcast %cst_54 : f32 to vector<64x64xf32>
    %61 = arith.mulf %60, %57 : vector<64x64xf32>
    %62 = arith.select %59, %57, %61 : vector<64x64xi1>, vector<64x64xf32>
    %63 = arith.truncf %62 : vector<64x64xf32> to vector<64x64xbf16>
    %c0_55 = arith.constant 0 : index
    %c0_56 = arith.constant 0 : index
    %c0_57 = arith.constant 0 : index
    %64 = vector.load %arg4[%c0_55, %c0_56, %c0_57] : memref<1x64x64xbf16, #tpu.memory_space<vmem>>, vector<1x64x64xbf16>
    %65 = vector.shape_cast %64 : vector<1x64x64xbf16> to vector<64x64xbf16>
    %66 = vector.shape_cast %63 : vector<64x64xbf16> to vector<1x64x64xbf16>
    tpu.vector_store %arg4[%c0_55, %c0_56, %c0_57], %66 {strides = array<i32>} : memref<1x64x64xbf16, #tpu.memory_space<vmem>>, vector<1x64x64xbf16>,
    return
  }
  func.func @transform_0(%arg0: i32) -> (i32, i32, i32, i32) {
    %c0_i32 = arith.constant 0 : i32
    %c0_i32_0 = arith.constant 0 : i32
    %c0_i32_1 = arith.constant 0 : i32
    %c0_i32_2 = arith.constant 0 : i32
    return %arg0, %c0_i32, %c0_i32_0, %c0_i32_1 : i32, i32, i32, i32
  }
  func.func @transform_1(%arg0: i32) -> (i32, i32) {
    %c0_i32 = arith.constant 0 : i32
    %c0_i32_0 = arith.constant 0 : i32
    %c0_i32_1 = arith.constant 0 : i32
    return %c0_i32, %c0_i32_0 : i32, i32
  }
  func.func @transform_2(%arg0: i32) -> (i32, i32) {
    %c0_i32 = arith.constant 0 : i32
    %c0_i32_0 = arith.constant 0 : i32
    %c0_i32_1 = arith.constant 0 : i32
    return %c0_i32, %c0_i32_0 : i32, i32
  }
  func.func @transform_3(%arg0: i32) -> (i32, i32, i32) {
    %c0_i32 = arith.constant 0 : i32
    %c0_i32_0 = arith.constant 0 : i32
    %c0_i32_1 = arith.constant 0 : i32
    return %arg0, %c0_i32, %c0_i32_0 : i32, i32, i32
  }
}

</mosaic_0001>

<bundles_post_ra>
// kernel: tpu_custom_call.1
= control target key start
LH: loop header
LB: loop body
LE: loop exit
PB: predicated region body
PF: predicated region fallthrough
CT: control target
= control target key end

     0   :  { %8 = vsyncpa [#allocation3], 0  ;;  %s2617_s0 = inlined_call_operand.vmem [shape: bf16[8,9,9,8], index: 0, kind: input, shape index: {}]   ;;  %s2618_s1 = inlined_call_operand.vmem [shape: bf16[72,64], index: 1, kind: input, shape index: {}]   ;;  %s2619_s2 = inlined_call_operand.vmem [shape: f32[1,64], index: 2, kind: input, shape index: {}]   ;;  %s2620_s3 = inlined_call_operand.hbm [shape: bf16[2,64,64], index: 3, kind: output, shape index: {}]  }
   0x1   :  { %10 = vsyncpa [#allocation3 + $0x1], 0  ;;  %s2252_s12 = smov 0   ;;  %s2254_s13 = smov 0  }
   0x2   :  { %s2256_s14 = smov 0   ;;  %s2258_s15 = smov 0  }
   0x3 LB: > { %s2273_s16 = sadd.s32 4294967295, %s2227_s15   ;;  %s1714_s17 = sadd.s32 4294967294, %s2227_s15   ;;  %s2227_s15 = sphi %s2258_s15, %s2628_s15   ;;  %s2223_s14 = sphi %s2256_s14, %s2627_s14   ;;  %s2219_s13 = sphi %s2254_s13, %s2626_s13   ;;  %s2215_s12 = sphi %s2252_s12, %s2625_s12  }
   0x4   : > { %s2277_s18 = sadd.s32 1, %s2227_s15   ;;  %s91_s19 = sadd.s32 1, %s2223_s14 }
   0x5   : > { %s88_s20 = ssub.s32 %s2227_s15, %s2277_s18  ;;  %p101_p0 = scmp.ne.s32.totalorder %s2223_s14, %s2219_s13 }
   0x6   : > { %p89_p1 = scmp.eq.s32.totalorder %s88_s20, 0  ;;  %p102_p2 = scmp.eq.s32.totalorder %s2273_s16, 1 }
   0x7   : > { %p107_p3 = scmp.ne.s32.totalorder %s2219_s13, %s2215_s12  ;;  %p108_p4 = scmp.eq.s32.totalorder %s1714_s17, 1 }
   0x8   : > { %s2288_s21 = scalar_select %p89_p1, %s2223_s14, %s91_s19  }
   0x9   : > { %p2290_p5 = por %p102_p2, %p101_p0  ;;  %p2294_p6 = por %p108_p4, %p107_p3 }
   0xa   : > { %p1717_p7 = scmp.ge.s32.totalorder %s2227_s15, 1  ;;  %p142_p8 = scmp.lt.s32.totalorder %s2227_s15, 3 }
   0xc   : > { %p143_p9 = pnand %p1717_p7, %p142_p8 }
   0xd   : > { %v193_v0 = vld [vmem:[%s2618_s1 + $0x4] sm:$0xf] (!%p143_p9)  ;;  %vm227_vm0 = vcmask (!%p143_p9), 1043456   ;;  %v2306_v1 = vld [vmem:[%s2618_s1 + $0x10] sm:$0xf] (!%p143_p9)  ;;  %s1719_s28 = sshll.u32 (!%p143_p9), %s2273_s16, 2 }
   0xe   : > { %146 = sbr.rel (%p143_p9) target bundleno = 341 (0x155), region = 32  ;;  %2089 = vmatprep.subr.msk.bf16.mxu1 (!%p143_p9), %vm227_vm0, %v193_v0  ;;  %2093 = vmatprep.subr.msk.bf16.mxu0 (!%p143_p9), %vm227_vm0, %v2306_v1  ;;  %v229_v2 = vsel (!%p143_p9), %vm227_vm0, %v193_v0, 0  ;;  %v2315_v3 = vsel (!%p143_p9), %vm227_vm0, %v2306_v1, 0  ;;  %p168_p10 = scmp.lt.s32.totalorder (!%p143_p9), %s1719_s28, 7  ;;  %v183_v4 = vld [vmem:[%s2618_s1] sm:$0xf] (!%p143_p9) }
   0xf   : > { %1934 = vmatpush3.bf16.msra.mxu1 (!%p143_p9), %v229_v2  ;;  %1974 = vmatpush3.bf16.msra.mxu0 (!%p143_p9), %v2315_v3  ;;  %v992_v5 = vld [vmem:[%s2618_s1 + $0x14] sm:$0xf] (!%p143_p9)  ;;  %vm214_vm1 = vcmask (!%p143_p9), 64512   ;;  %v329_v6 = vsel (!%p143_p9), %vm227_vm0, %v183_v4, 0  ;;  %v1102_v9 = vld [vmem:[%s2618_s1 + $0x18] sm:$0xf] (!%p143_p9) }
  0x10   : > { %2090 = vmatprep.subr.msk.bf16.mxu1 (!%p143_p9), %vm227_vm0, %v183_v4  ;;  %2095 = vmatprep.subr.msk.bf16.mxu0 (!%p143_p9), %vm227_vm0, %v992_v5  ;;  %v1018_v7 = vsel (!%p143_p9), %vm227_vm0, %v992_v5, 0  ;;  %v527_v10 = vld [vmem:[%s2618_s1 + $0x8] sm:$0xf] (!%p143_p9)  ;;  %vm412_vm2 = vsmask.f32 (!%p143_p9), 3328  ;;  %v2349_v15 = vsel (!%p143_p9), %vm227_vm0, %v1102_v9, 0 }
  0x11   : > { %vm413_vm3 = vsmask.f32 (!%p143_p9), 7440  ;;  %v2352_v16 = vsel (!%p143_p9), %vm227_vm0, %v527_v10, 0  ;;  %s164_s4 = sand.u32 (!%p143_p9), 1, %s2219_s13   ;;  %vm1629_vm7 = vcmask (!%p143_p9), 519168   ;;  %s1887_s7 = sshll.u32 (!%p143_p9), %s2273_s16, 9 }
  0x12   : > { %vm2369_vm4 = vmor (!%p143_p9), %vm412_vm2, %vm413_vm3  ;;  %s1718_s5 = sshll.u32 (!%p143_p9), %s164_s4, 5  ;;  %s2564_s11 = scalar_lea.hbm (!%p143_p9), %s2620_s3, %s1887_s7 }
  0x13   : > { %s2576_s16 = scalar_lea.sflag (!%p143_p9), [#allocation3], %s164_s4  ;;  %s2229_s19 = smov (!%p143_p9), [#allocation2]  }
  0x14   : > { %s2169_s20 = sshll.u32 (!%p143_p9), %s2229_s19, 4  ;;  %s2170_s20 = int_to_ptr.vmem [resolvable:$false] %s2169_s20 }
  0x15   : > { %s2630_s28 = smov (!%p168_p10, %s1719_s28), 7  ;;  %s2171_s24 = scalar_lea.vmem %s2170_s20, 1024 }
  0x16   : > { %s2099_s6 = smul.u32 72, %s2630_s28 }
  0x18   : > { %s2329_s9 = scalar_lea.vmem %s2617_s0, %s2099_s6  ;;  %s2547_s6 = scalar_lea.vmem [#allocation2], %s1718_s5 }
  0x19   : > { %v2141_v8 = vld [vmem:[%s2329_s9 + $0x48] ss:$8 sps:$4 sm:$0xff]   ;;  %v2142_v11 = vld [vmem:[%s2329_s9 + $0xd8] ss:$8 sps:$4 sm:$0xff]   ;;  %v1786_v19 = vld [vmem:[%s2329_s9 + $0x94] sm:$0x1] }
  0x1a   : > { %1935 = vmatprep.mubr.msk.bf16.mxu1 %vm214_vm1, %v2141_v8  ;;  %v2143_v12 = vld [vmem:[%s2329_s9 + $0x58] ss:$8 sps:$4 sm:$0xff]   ;;  %1975 = vmatprep.mubr.msk.bf16.mxu0 %vm214_vm1, %v2142_v11  ;;  %v2144_v13 = vld [vmem:[%s2329_s9 + $0xe8] ss:$8 sps:$4 sm:$0xff]   ;;  %v1788_v21 = vld [vmem:[%s2329_s9 + $0x9c] sm:$0x1] }
  0x1b   : > { %1936 = vmatmul.mubr.msk.bf16.vlgmr.msra.gmra.mrb[0].mxu1 %vm214_vm1, %v2143_v12  ;;  %v2145_v14 = vld [vmem:[%s2329_s9 + $0x68] ss:$8 sps:$4 sm:$0xff]   ;;  %1976 = vmatmul.mubr.msk.bf16.vlgmr.msra.gmra.mrb[0].mxu0 %vm214_vm1, %v2144_v13  ;;  %v2146_v17 = vld [vmem:[%s2329_s9 + $0x78] ss:$8 sps:$4 sm:$0xff]   ;;  %v890_v24 = vshll.u32 %v1786_v19, 16  ;;  %v904_v27 = vshll.u32 %v1788_v21, 16 }
  0x1c   : > { %1944 = vmatpush3.bf16.msra.mxu1 %v329_v6  ;;  %1984 = vmatpush3.bf16.msra.mxu0 %v1018_v7  ;;  %v1785_v18 = vld [vmem:[%s2329_s9 + $0x90] sm:$0xf]  ;;  %v1787_v20 = vld [vmem:[%s2329_s9 + $0x98] sm:$0xf]  ;;  %v1789_v28 = vld [vmem:[%s2329_s9 + $0xa0] sm:$0xf] }
  0x1d   : > { %1939 = vmatprep.mubr.msk.bf16.mxu1 %vm214_vm1, %v2145_v14  ;;  %v881_v22 = vshrl.u32 %v1785_v18, 16  ;;  %v884_v23 = vshll.u32 %v1785_v18, 16  ;;  %v895_v25 = vshrl.u32 %v1787_v20, 16  ;;  %2096 = vmatprep.subr.msk.bf16.mxu0 %vm227_vm0, %v1102_v9  ;;  %v898_v26 = vshll.u32 %v1787_v20, 16  ;;  %v1790_v29 = vld [vmem:[%s2329_s9 + $0xa4] sm:$0x1] }
  0x1e   : > { %2091 = vmatprep.subr.msk.bf16.mxu1 %vm227_vm0, %v527_v10  ;;  %v892_v32 = vrot.slane %v890_v24, 5  ;;  %v1791_v34 = vld [vmem:[%s2329_s9 + $0xa8] sm:$0xf]  ;;  %v906_v36 = vrot.slane %v904_v27, 5  ;;  %v1792_v37 = vld [vmem:[%s2329_s9 + $0xac] sm:$0x1] }
  0x1f   : > { %v883_v30 = vrot.slane %v881_v22, 4  ;;  %v886_v31 = vrot.slane %v884_v23, 5  ;;  %v897_v33 = vrot.slane %v895_v25, 4  ;;  %v900_v35 = vrot.slane %v898_v26, 5  ;;  %v2147_v53 = vld [vmem:[%s2329_s9] ss:$8 sps:$4 sm:$0xff]  }
  0x20   : > { %v909_v38 = vshrl.u32 %v1789_v28, 16  ;;  %v912_v39 = vshll.u32 %v1789_v28, 16  ;;  %v918_v41 = vshll.u32 %v1790_v29, 16  ;;  %v923_v42 = vshrl.u32 %v1791_v34, 16  ;;  %v2148_v59 = vld [vmem:[%s2329_s9 + $0x10] ss:$8 sps:$4 sm:$0xff]  }
  0x21   : > { %v887_v40 = vor.u32 %v886_v31, %v883_v30  ;;  %v926_v43 = vshll.u32 %v1791_v34, 16  ;;  %v901_v45 = vor.u32 %v900_v35, %v897_v33  ;;  %v932_v48 = vshll.u32 %v1792_v37, 16  ;;  %v1793_v60 = vld [vmem:[%s2329_s9 + $0xb0] sm:$0xf]  ;;  %v1794_v61 = vld [vmem:[%s2329_s9 + $0xb4] sm:$0x1] }
  0x22   : > { %v911_v46 = vrot.slane %v909_v38, 4  ;;  %v914_v47 = vrot.slane %v912_v39, 5  ;;  %v920_v50 = vrot.slane %v918_v41, 5  ;;  %v925_v51 = vrot.slane %v923_v42, 4  ;;  %v1795_v0 = vld [vmem:[%s2329_s9 + $0xb8] sm:$0xf] }
  0x23   : > { %1940 = vmatmul.mubr.msk.bf16.gmra.mrb[4].mxu1 %vm214_vm1, %v2146_v17  ;;  %v888_v49 = vrot.slane %v887_v40, 4  ;;  %v928_v52 = vrot.slane %v926_v43, 5  ;;  %v902_v54 = vrot.slane %v901_v45, 4  ;;  %v934_v56 = vrot.slane %v932_v48, 5  ;;  %v1796_v2 = vld [vmem:[%s2329_s9 + $0xbc] sm:$0x1] }
  0x24   : > { %v915_v55 = vor.u32 %v914_v47, %v911_v46  ;;  %1945 = vmatprep.mubr.msk.bf16.mxu1 %vm214_vm1, %v2147_v53  ;;  %v937_v4 = vshrl.u32 %v1793_v60, 16  ;;  %v940_v7 = vshll.u32 %v1793_v60, 16  ;;  %v946_v8 = vshll.u32 %v1794_v61, 16  ;;  %v1797_v9 = vld [vmem:[%s2329_s9 + $0xc0] sm:$0xf]  ;;  %s1652_s8 = sshll.u32 %s2547_s6, 4  ;;  %s2566_s8 = int_to_ptr.vmem [resolvable:$true] %s1652_s8 }
  0x25   : > { %v893_v57 = vsel %vm2369_vm4, %v888_v49, %v892_v32  ;;  %v929_v58 = vor.u32 %v928_v52, %v925_v51  ;;  %v907_v62 = vsel %vm2369_vm4, %v902_v54, %v906_v36  ;;  %v2388_v10 = vld [vmem:[%s2618_s1 + $0xc] sm:$0xf]  ;;  %v951_v13 = vshrl.u32 %v1795_v0, 16  ;;  %v1798_v17 = vld [vmem:[%s2329_s9 + $0xc4] sm:$0x1]  ;;  %s2165_s17 = scalar_lea.vmem %s2566_s8, 512  ;;  %p2172_p0 = scmp.lt.s32.totalorder %s2566_s8, %s2170_s20 }
  0x26   : > { %v916_v63 = vrot.slane %v915_v55, 4  ;;  %v1801_v5 = vcombine.low %v893_v57, %v907_v62  ;;  %v939_v12 = vrot.slane %v937_v4, 4  ;;  %v954_v14 = vshll.u32 %v1795_v0, 16  ;;  %v1799_v22 = vld [vmem:[%s2329_s9 + $0xc8] sm:$0xf]  ;;  %p2166_p11 = scmp.ne.s32.totalorder %s2566_s8, %s2165_s17  ;;  %p2173_p1 = scmp.lt.s32.totalorder %s2171_s24, %s2165_s17 }
  0x27   : > { %v930_v6 = vrot.slane %v929_v58, 4  ;;  %v942_v19 = vrot.slane %v940_v7, 5  ;;  %v948_v20 = vrot.slane %v946_v8, 5  ;;  %v960_v21 = vshll.u32 %v1796_v2, 16  ;;  %v2400_v23 = vld [vmem:[%s2618_s1 + $0x1c] sm:$0xf] }
  0x28   : > { %v921_v11 = vsel %vm2369_vm4, %v916_v63, %v920_v50  ;;  %1985 = vmatprep.mubr.msk.bf16.mxu0 %vm214_vm1, %v1801_v5  ;;  %v953_v25 = vrot.slane %v951_v13, 4  ;;  %v956_v26 = vrot.slane %v954_v14, 5  ;;  %v1800_v27 = vld [vmem:[%s2329_s9 + $0xcc] sm:$0x1]  ;;  %v965_v28 = vshrl.u32 %v1797_v9, 16  ;;  %p2167_p12 = pnand %p2166_p11, %p2290_p5  ;;  %p2174_p2 = por %p2173_p1, %p2172_p0 }
  0x29   : > { %v935_v18 = vsel %vm2369_vm4, %v930_v6, %v934_v56  ;;  %v943_v29 = vor.u32 %v942_v19, %v939_v12  ;;  %v962_v30 = vrot.slane %v960_v21, 5  ;;  %v968_v31 = vshll.u32 %v1797_v9, 16  ;;  %v2151_v53 = vld [vmem:[%s2329_s9 + $0x8] ss:$8 sps:$4 sm:$0xff]   ;;  %v396_v54 = vld [vmem:[%s2329_s9] sm:$0xf] }
  0x2a   : > { %v1802_v24 = vcombine.low %v921_v11, %v935_v18  ;;  %v974_v32 = vshll.u32 %v1798_v17, 16  ;;  %v957_v33 = vor.u32 %v956_v26, %v953_v25  ;;  %v967_v34 = vrot.slane %v965_v28, 4  ;;  %v397_v56 = vld [vmem:[%s2329_s9 + $0x4] sm:$0x1]  ;;  %v398_v57 = vld [vmem:[%s2329_s9 + $0x8] sm:$0xf]  ;;  %p2168_p13 = pneg %p2167_p12 }
  0x2b   : > { %1946 = vmatmul.mubr.msk.bf16.vlgmr.msra.gmra.mrb[0].mxu1 %vm214_vm1, %v2148_v59  ;;  %v979_v35 = vshrl.u32 %v1799_v22, 16  ;;  %v982_v36 = vshll.u32 %v1799_v22, 16  ;;  %v944_v37 = vrot.slane %v943_v29, 4  ;;  %v970_v38 = vrot.slane %v968_v31, 5  ;;  %v399_v58 = vld [vmem:[%s2329_s9 + $0xc] sm:$0x1] }
  0x2c   : > { %1954 = vmatpush3.bf16.msra.mxu1 %v2352_v16  ;;  %1986 = vmatmul.mubr.msk.bf16.vlgmr.msra.gmra.mrb[0].mxu0 %vm214_vm1, %v1802_v24  ;;  %v988_v39 = vshll.u32 %v1800_v27, 16  ;;  %v2149_v16 = vld [vmem:[%s2329_s9 + $0x20] ss:$8 sps:$4 sm:$0xff]   ;;  %v958_v40 = vrot.slane %v957_v33, 4  ;;  %v976_v46 = vrot.slane %v974_v32, 5  ;;  %v416_v60 = vshrl.u32 %v396_v54, 16  ;;  %p2175_p3 = pnand %p2174_p2, %p2168_p13 }
  0x2d   : > { %2092 = vmatprep.subr.msk.bf16.mxu1 %vm227_vm0, %v2388_v10  ;;  %1994 = vmatpush3.bf16.msra.mxu0 %v2349_v15  ;;  %v981_v41 = vrot.slane %v979_v35, 4  ;;  %v984_v42 = vrot.slane %v982_v36, 5  ;;  %v949_v43 = vsel %vm2369_vm4, %v944_v37, %v948_v20  ;;  %v971_v45 = vor.u32 %v970_v38, %v967_v34  ;;  %v2150_v15 = vld [vmem:[%s2329_s9 + $0x30] ss:$8 sps:$4 sm:$0xff]   ;;  %v401_v6 = vld [vmem:[%s2329_s9 + $0x14] sm:$0x1] }
  0x2e   : > { %2097 = vmatprep.subr.msk.bf16.mxu0 %vm227_vm0, %v2400_v23  ;;  %1949 = vmatprep.mubr.msk.bf16.mxu1 %vm214_vm1, %v2149_v16  ;;  %v963_v47 = vsel %vm2369_vm4, %v958_v40, %v962_v30  ;;  %v990_v49 = vrot.slane %v988_v39, 5  ;;  %v419_v61 = vshll.u32 %v396_v54, 16  ;;  %v425_v62 = vshll.u32 %v397_v56, 16  ;;  %v400_v63 = vld [vmem:[%s2329_s9 + $0x10] sm:$0xf] }
  0x2f   : > { %v985_v48 = vor.u32 %v984_v42, %v981_v41  ;;  %v1803_v50 = vcombine.low %v949_v43, %v963_v47  ;;  %v972_v51 = vrot.slane %v971_v45, 4  ;;  %v430_v2 = vshrl.u32 %v398_v57, 16  ;;  %v402_v11 = vld [vmem:[%s2329_s9 + $0x18] sm:$0xf]  ;;  %v403_v18 = vld [vmem:[%s2329_s9 + $0x1c] sm:$0x1] }
  0x30   : > { %v433_v4 = vshll.u32 %v398_v57, 16  ;;  %v439_v5 = vshll.u32 %v399_v58, 16  ;;  %v418_v7 = vrot.slane %v416_v60, 4  ;;  %v421_v8 = vrot.slane %v419_v61, 5  ;;  %v2152_v29 = vld [vmem:[%s2329_s9 + $0x18] ss:$8 sps:$4 sm:$0xff]  }
  0x31   : > { %v986_v52 = vrot.slane %v985_v48, 4  ;;  %1989 = vmatprep.mubr.msk.bf16.mxu0 %vm214_vm1, %v1803_v50  ;;  %v977_v55 = vsel %vm2369_vm4, %v972_v51, %v976_v46  ;;  %v427_v9 = vrot.slane %v425_v62, 5  ;;  %v444_v12 = vshrl.u32 %v400_v63, 16  ;;  %v2153_v37 = vld [vmem:[%s2329_s9 + $0x28] ss:$8 sps:$4 sm:$0xff]  }
  0x32   : > { %v432_v13 = vrot.slane %v430_v2, 4  ;;  %v435_v14 = vrot.slane %v433_v4, 5  ;;  %v441_v17 = vrot.slane %v439_v5, 5  ;;  %v447_v19 = vshll.u32 %v400_v63, 16  ;;  %v404_v40 = vld [vmem:[%s2329_s9 + $0x20] sm:$0xf] }
  0x33   : > { %1950 = vmatmul.mubr.msk.bf16.gmra.mrb[4].mxu1 %vm214_vm1, %v2150_v15  ;;  %v991_v59 = vsel %vm2369_vm4, %v986_v52, %v990_v49  ;;  %v422_v20 = vor.u32 %v421_v8, %v418_v7  ;;  %v446_v21 = vrot.slane %v444_v12, 4  ;;  %v453_v22 = vshll.u32 %v401_v6, 16  ;;  %v405_v45 = vld [vmem:[%s2329_s9 + $0x24] sm:$0x1]  ;;  %v406_v46 = vld [vmem:[%s2329_s9 + $0x28] sm:$0xf] }
  0x34   : > { %v1804_v0 = vcombine.low %v977_v55, %v991_v59  ;;  %v458_v24 = vshrl.u32 %v402_v11, 16  ;;  %v436_v25 = vor.u32 %v435_v14, %v432_v13  ;;  %v449_v26 = vrot.slane %v447_v19, 5  ;;  %v407_v48 = vld [vmem:[%s2329_s9 + $0x2c] sm:$0x1]  ;;  %v408_v55 = vld [vmem:[%s2329_s9 + $0x30] sm:$0xf] }
  0x35   : > { %v461_v27 = vshll.u32 %v402_v11, 16  ;;  %v467_v28 = vshll.u32 %v403_v18, 16  ;;  %v1254_v30 = vsel %vm227_vm0, %v2400_v23, 0  ;;  %v423_v31 = vrot.slane %v422_v20, 4  ;;  %v2447_v23 = vld [vmem:[%s2618_s1 + $0x20] sm:$0xf] }
  0x36   : > { %1990 = vmatmul.mubr.msk.bf16.gmra.mrb[4].mxu0 %vm214_vm1, %v1804_v0  ;;  %v455_v32 = vrot.slane %v453_v22, 5  ;;  %v460_v33 = vrot.slane %v458_v24, 4  ;;  %v437_v34 = vrot.slane %v436_v25, 4  ;;  %v450_v35 = vor.u32 %v449_v26, %v446_v21  ;;  %v409_v60 = vld [vmem:[%s2329_s9 + $0x34] sm:$0x1] }
  0x37   : > { %1995 = vmatprep.mubr.msk.bf16.mxu0 %vm214_vm1, %v2151_v53  ;;  %v463_v36 = vrot.slane %v461_v27, 5  ;;  %v428_v38 = vsel %vm2369_vm4, %v423_v31, %v427_v9  ;;  %v469_v39 = vrot.slane %v467_v28, 5  ;;  %v671_v16 = vsel %vm227_vm0, %v2388_v10, 0  ;;  %v2154_v62 = vld [vmem:[%s2329_s9 + $0x38] ss:$8 sps:$4 sm:$0xff]  }
  0x38   : > { %v442_v41 = vsel %vm2369_vm4, %v437_v34, %v441_v17  ;;  %v451_v42 = vrot.slane %v450_v35, 4  ;;  %v472_v15 = vshrl.u32 %v404_v40, 16  ;;  %v475_v49 = vshll.u32 %v404_v40, 16  ;;  %v410_v0 = vld [vmem:[%s2329_s9 + $0x38] sm:$0xf] }
  0x39   : > { %v464_v43 = vor.u32 %v463_v36, %v460_v33  ;;  %v1745_v47 = vcombine.low %v428_v38, %v442_v41  ;;  %v481_v10 = vshll.u32 %v405_v45, 16  ;;  %v486_v50 = vshrl.u32 %v406_v46, 16  ;;  %v411_v2 = vld [vmem:[%s2329_s9 + $0x3c] sm:$0x1]  ;;  %v2155_v14 = vld [vmem:[%s2329_s9 + $0x50] ss:$8 sps:$4 sm:$0xff]  }
  0x3a   : > { %v456_v51 = vsel %vm2369_vm4, %v451_v42, %v455_v32  ;;  %v474_v53 = vrot.slane %v472_v15, 4  ;;  %v489_v54 = vshll.u32 %v406_v46, 16  ;;  %v477_v56 = vrot.slane %v475_v49, 5  ;;  %v2156_v35 = vld [vmem:[%s2329_s9 + $0x60] ss:$8 sps:$4 sm:$0xff]  }
  0x3b   : > { %v465_v52 = vrot.slane %v464_v43, 4  ;;  %1955 = vmatprep.mubr.msk.bf16.mxu1 %vm214_vm1, %v1745_v47  ;;  %v483_v57 = vrot.slane %v481_v10, 5  ;;  %v488_v58 = vrot.slane %v486_v50, 4  ;;  %v495_v59 = vshll.u32 %v407_v48, 16  ;;  %v1842_v40 = vld [vmem:[%s2329_s9 + $0xc] sm:$0x1] }
  0x3c   : > { %v491_v63 = vrot.slane %v489_v54, 5  ;;  %v500_v4 = vshrl.u32 %v408_v55, 16  ;;  %v478_v6 = vor.u32 %v477_v56, %v474_v53  ;;  %v503_v8 = vshll.u32 %v408_v55, 16  ;;  %v1843_v41 = vld [vmem:[%s2329_s9 + $0x10] sm:$0xf] }
  0x3d   : > { %v470_v61 = vsel %vm2369_vm4, %v465_v52, %v469_v39  ;;  %v497_v7 = vrot.slane %v495_v59, 5  ;;  %v509_v12 = vshll.u32 %v409_v60, 16  ;;  %v514_v13 = vshrl.u32 %v410_v0, 16  ;;  %v2159_v39 = vld [vmem:[%s2329_s9 + $0x70] ss:$8 sps:$4 sm:$0xff]  }
  0x3e   : > { %1996 = vmatmul.mubr.msk.bf16.vlgmr.msra.gmra.mrb[0].mxu0 %vm214_vm1, %v2152_v29  ;;  %v1746_v5 = vcombine.low %v456_v51, %v470_v61  ;;  %v492_v9 = vor.u32 %v491_v63, %v488_v58  ;;  %v502_v11 = vrot.slane %v500_v4, 4  ;;  %v479_v17 = vrot.slane %v478_v6, 4  ;;  %v1844_v42 = vld [vmem:[%s2329_s9 + $0x14] sm:$0x1]  ;;  %v1845_v48 = vld [vmem:[%s2329_s9 + $0x18] sm:$0xf] }
  0x3f   : > { %2004 = vmatpush3.bf16.msra.mxu0 %v1254_v30  ;;  %1999 = vmatprep.mubr.msk.bf16.mxu0 %vm214_vm1, %v2153_v37  ;;  %v505_v18 = vrot.slane %v503_v8, 5  ;;  %v517_v19 = vshll.u32 %v410_v0, 16  ;;  %v523_v20 = vshll.u32 %v411_v2, 16  ;;  %v516_v22 = vrot.slane %v514_v13, 4  ;;  %v2157_v37 = vld [vmem:[%s2329_s9 + $0x90] ss:$8 sps:$4 sm:$0xff]  }
  0x40   : > { %2098 = vmatprep.subr.msk.bf16.mxu0 %vm227_vm0, %v2447_v23  ;;  %1956 = vmatmul.mubr.msk.bf16.vlgmr.msra.gmra.mrb[0].mxu1 %vm214_vm1, %v1746_v5  ;;  %v493_v21 = vrot.slane %v492_v9, 4  ;;  %v484_v24 = vsel %vm2369_vm4, %v479_v17, %v483_v57  ;;  %v511_v26 = vrot.slane %v509_v12, 5  ;;  %v1483_v34 = vsel %vm227_vm0, %v2447_v23, 0  ;;  %v1846_v50 = vld [vmem:[%s2329_s9 + $0x1c] sm:$0x1] }
  0x41   : > { %1964 = vmatpush3.bf16.msra.mxu1 %v671_v16  ;;  %v506_v25 = vor.u32 %v505_v18, %v502_v11  ;;  %v519_v27 = vrot.slane %v517_v19, 5  ;;  %v525_v32 = vrot.slane %v523_v20, 5  ;;  %v1841_v16 = vld [vmem:[%s2329_s9 + $0x8] sm:$0xf]  ;;  %v1355_v23 = vshll.u32 %v1842_v40, 16 }
  0x42   : > { %2094 = vmatprep.subr.msk.bf16.mxu1 %vm227_vm0, %v2306_v1  ;;  %v498_v28 = vsel %vm2369_vm4, %v493_v21, %v497_v7  ;;  %v1346_v43 = vshrl.u32 %v1841_v16, 16  ;;  %v1349_v45 = vshll.u32 %v1841_v16, 16  ;;  %v1360_v46 = vshrl.u32 %v1843_v41, 16  ;;  %v1847_v51 = vld [vmem:[%s2329_s9 + $0x20] sm:$0xf] }
  0x43   : > { %v1747_v29 = vcombine.low %v484_v24, %v498_v28  ;;  %v507_v30 = vrot.slane %v506_v25, 4  ;;  %v520_v31 = vor.u32 %v519_v27, %v516_v22  ;;  %v1363_v15 = vshll.u32 %v1843_v41, 16  ;;  %v2158_v52 = vld [vmem:[%s2329_s9 + $0xa0] ss:$8 sps:$4 sm:$0xff]   ;;  %v1848_v58 = vld [vmem:[%s2329_s9 + $0x24] sm:$0x1] }
  0x44   : > { %v1369_v47 = vshll.u32 %v1844_v42, 16  ;;  %v1348_v49 = vrot.slane %v1346_v43, 4  ;;  %v1351_v10 = vrot.slane %v1349_v45, 5  ;;  %v2160_v53 = vld [vmem:[%s2329_s9 + $0x80] ss:$8 sps:$4 sm:$0xff]   ;;  %v1357_v54 = vrot.slane %v1355_v23, 5 }
  0x45   : > { %1959 = vmatprep.mubr.msk.bf16.mxu1 %vm214_vm1, %v1747_v29  ;;  %v512_v1 = vsel %vm2369_vm4, %v507_v30, %v511_v26  ;;  %v521_v33 = vrot.slane %v520_v31, 4  ;;  %v1362_v55 = vrot.slane %v1360_v46, 4  ;;  %v1365_v56 = vrot.slane %v1363_v15, 5  ;;  %v2161_v5 = vld [vmem:[%s2329_s9 + $0xb0] ss:$8 sps:$4 sm:$0xff]  }
  0x46   : > { %2000 = vmatmul.mubr.msk.bf16.gmra.mrb[4].mxu0 %vm214_vm1, %v2154_v62  ;;  %v1371_v57 = vrot.slane %v1369_v47, 5  ;;  %v1352_v59 = vor.u32 %v1351_v10, %v1348_v49  ;;  %v1374_v60 = vshrl.u32 %v1845_v48, 16  ;;  %v1377_v61 = vshll.u32 %v1845_v48, 16  ;;  %v1849_v17 = vld [vmem:[%s2329_s9 + $0x28] sm:$0xf] }
  0x47   : > { %2005 = vmatprep.mubr.msk.bf16.mxu0 %vm214_vm1, %v2155_v14  ;;  %v526_v36 = vsel %vm2369_vm4, %v521_v33, %v525_v32  ;;  %v1383_v62 = vshll.u32 %v1846_v50, 16  ;;  %v1366_v63 = vor.u32 %v1365_v56, %v1362_v55  ;;  %v1388_v0 = vshrl.u32 %v1847_v51, 16  ;;  %v1850_v20 = vld [vmem:[%s2329_s9 + $0x2c] sm:$0x1]  ;;  %v1851_v21 = vld [vmem:[%s2329_s9 + $0x30] sm:$0xf] }
  0x48   : > { %v1748_v38 = vcombine.low %v512_v1, %v526_v36  ;;  %v1391_v2 = vshll.u32 %v1847_v51, 16  ;;  %v1397_v4 = vshll.u32 %v1848_v58, 16  ;;  %v1353_v6 = vrot.slane %v1352_v59, 4  ;;  %v1852_v22 = vld [vmem:[%s2329_s9 + $0x34] sm:$0x1] }
  0x49   : > { %v1376_v7 = vrot.slane %v1374_v60, 4  ;;  %v1379_v8 = vrot.slane %v1377_v61, 5  ;;  %v1385_v9 = vrot.slane %v1383_v62, 5  ;;  %v1367_v11 = vrot.slane %v1366_v63, 4  ;;  %v2162_v32 = vld [vmem:[%s2329_s9 + $0xc0] ss:$8 sps:$4 sm:$0xff]  }
  0x4a   : > { %1960 = vmatmul.mubr.msk.bf16.gmra.mrb[4].mxu1 %vm214_vm1, %v1748_v38  ;;  %v1390_v12 = vrot.slane %v1388_v0, 4  ;;  %v1393_v13 = vrot.slane %v1391_v2, 5  ;;  %v1399_v14 = vrot.slane %v1397_v4, 5  ;;  %v1358_v18 = vsel %vm2369_vm4, %v1353_v6, %v1357_v54  ;;  %v1853_v36 = vld [vmem:[%s2329_s9 + $0x38] sm:$0xf] }
  0x4b   : > { %1965 = vmatprep.mubr.msk.bf16.mxu1 %vm214_vm1, %v2157_v37  ;;  %v1380_v19 = vor.u32 %v1379_v8, %v1376_v7  ;;  %v1372_v24 = vsel %vm2369_vm4, %v1367_v11, %v1371_v57  ;;  %v1402_v26 = vshrl.u32 %v1849_v17, 16  ;;  %v1405_v27 = vshll.u32 %v1849_v17, 16  ;;  %v1854_v16 = vld [vmem:[%s2329_s9 + $0x3c] sm:$0x1]  ;;  %v1855_v43 = vld [vmem:[%s2329_s9 + $0x40] sm:$0xf] }
  0x4c   : > { %v1394_v25 = vor.u32 %v1393_v13, %v1390_v12  ;;  %v1857_v28 = vcombine.low %v1358_v18, %v1372_v24  ;;  %v1411_v30 = vshll.u32 %v1850_v20, 16  ;;  %v1416_v31 = vshrl.u32 %v1851_v21, 16  ;;  %v1856_v45 = vld [vmem:[%s2329_s9 + $0x44] sm:$0x1]  ;;  %v2163_v15 = vld [vmem:[%s2329_s9 + $0xf8] ss:$8 sps:$4 sm:$0xff]  }
  0x4d   : > { %v1381_v29 = vrot.slane %v1380_v19, 4  ;;  %v1404_v33 = vrot.slane %v1402_v26, 4  ;;  %v1430_v23 = vshrl.u32 %v1853_v36, 16  ;;  %v1433_v48 = vshll.u32 %v1853_v36, 16  ;;  %v2164_v8 = vld [vmem:[%s2329_s9 + $0x108] ss:$8 sps:$4 sm:$0xff]  }
  0x4e   : > { %2006 = vmatmul.mubr.msk.bf16.vlgmr.msra.gmra.mrb[0].mxu0 %vm214_vm1, %v2156_v35  ;;  %v1395_v1 = vrot.slane %v1394_v25, 4  ;;  %v1419_v35 = vshll.u32 %v1851_v21, 16  ;;  %v1413_v37 = vrot.slane %v1411_v30, 5  ;;  %v1418_v38 = vrot.slane %v1416_v31, 4  ;;  %v1865_v18 = vld [vmem:[%s2619_s2] ss:$0 sm:$0xff] }
  0x4f   : > { %2014 = vmatpush3.bf16.msra.mxu0 %v1483_v34  ;;  %2009 = vmatprep.mubr.msk.bf16.mxu0 %vm214_vm1, %v2159_v39  ;;  %v1407_v34 = vrot.slane %v1405_v27, 5  ;;  %v1425_v39 = vshll.u32 %v1852_v22, 16  ;;  %v1439_v49 = vshll.u32 %v1854_v16, 16  ;;  %v1432_v51 = vrot.slane %v1430_v23, 4 }
  0x50   : > { %v1400_v40 = vsel %vm2369_vm4, %v1395_v1, %v1399_v14  ;;  %v1421_v42 = vrot.slane %v1419_v35, 5  ;;  %v1447_v54 = vshll.u32 %v1855_v43, 16  ;;  %v1453_v55 = vshll.u32 %v1856_v45, 16 }
  0x51   : > { %v1408_v41 = vor.u32 %v1407_v34, %v1404_v33  ;;  %v1427_v47 = vrot.slane %v1425_v39, 5  ;;  %v1441_v60 = vrot.slane %v1439_v49, 5 }
  0x52   : > { %1966 = vmatmul.mubr.msk.bf16.vlgmr.msra.gmra.mrb[0].mxu1 %vm214_vm1, %v2158_v52  ;;  %v1422_v50 = vor.u32 %v1421_v42, %v1418_v38  ;;  %v1444_v52 = vshrl.u32 %v1855_v43, 16  ;;  %v1449_v61 = vrot.slane %v1447_v54, 5  ;;  %v1455_v4 = vrot.slane %v1453_v55, 5 }
  0x53   : > { %2024 = vmatpush3.bf16.msra.mxu1 %v2315_v3  ;;  %1969 = vmatprep.mubr.msk.bf16.mxu1 %vm214_vm1, %v2161_v5  ;;  %v1386_v3 = vsel %vm2369_vm4, %v1381_v29, %v1385_v9  ;;  %v1409_v10 = vrot.slane %v1408_v41, 4 }
  0x54   : > { %v1858_v46 = vcombine.low %v1386_v3, %v1400_v40  ;;  %v1423_v57 = vrot.slane %v1422_v50, 4  ;;  %v1446_v58 = vrot.slane %v1444_v52, 4 }
  0x55   : > { %v1414_v56 = vsel %vm2369_vm4, %v1409_v10, %v1413_v37 }
  0x56   : > { %2010 = vmatmul.mubr.msk.bf16.gmra.mrb[4].mxu0 %vm214_vm1, %v2160_v53  ;;  %v1435_v53 = vrot.slane %v1433_v48, 5  ;;  %v1428_v62 = vsel %vm2369_vm4, %v1423_v57, %v1427_v47  ;;  %v1450_v2 = vor.u32 %v1449_v61, %v1446_v58 }
  0x57   : > { %2015 = vmatprep.mubr.msk.bf16.mxu0 %vm214_vm1, %v1857_v28  ;;  %v1859_v63 = vcombine.low %v1414_v56, %v1428_v62 }
  0x58   : > { %v1436_v59 = vor.u32 %v1435_v53, %v1432_v51  ;;  %v1451_v6 = vrot.slane %v1450_v2, 4 }
  0x5a   : > { %1970 = vmatmul.mubr.msk.bf16.gmra.mrb[4].mxu1 %vm214_vm1, %v2162_v32  ;;  %v1437_v0 = vrot.slane %v1436_v59, 4  ;;  %v1456_v7 = vsel %vm2369_vm4, %v1451_v6, %v1455_v4 }
  0x5b   : > { %1979 = vmatprep.mubr.msk.bf16.mxu1 %vm214_vm1, %v2163_v15 }
  0x5c   : > { %v1442_v5 = vsel %vm2369_vm4, %v1437_v0, %v1441_v60 }
  0x5d   : > { %v1860_v9 = vcombine.low %v1442_v5, %v1456_v7 }
  0x5e   : > { %2016 = vmatmul.mubr.msk.bf16.vlgmr.msra.gmra.mrb[0].mxu0 %vm214_vm1, %v1858_v46 }
  0x5f   : > { %2019 = vmatprep.mubr.msk.bf16.mxu0 %vm214_vm1, %v1859_v63 }
  0x66   : > { %2020 = vmatmul.mubr.msk.bf16.gmra.mrb[4].mxu0 %vm214_vm1, %v1860_v9  ;;  %1980 = vmatmul.mubr.msk.bf16.vlgmr.msra.gmra.mrb[4].mxu1 %vm214_vm1, %v2164_v8 }
 0x125   : > { %v1967_v11 = vpop.f32.mrb[0].mxu1 }
 0x126   : > { %v707_v12 = vpop.f32.mrb[1].mxu1 }
 0x127   : > { %v1968_v13 = vpop.f32.mrb[2].mxu1 }
 0x128   : > { %v710_v14 = vpop.f32.mrb[3].mxu1 }
 0x131   : > { %v2017_v17 = vpop.f32.mrb[0].mxu0 }
 0x132   : > { %v2025_v19 = vadd.f32 %v2017_v17, %v1967_v11  ;;  %v1519_v44 = vpop.f32.mrb[1].mxu0 }
 0x133   : > { %v2026_v20 = vadd.f32 %v1519_v44, %v707_v12  ;;  %v2018_v21 = vpop.f32.mrb[2].mxu0 }
 0x134   : > { %v1567_v22 = vadd.f32 %v2025_v19, %v1865_v18  ;;  %v2027_v24 = vadd.f32 %v2018_v21, %v1968_v13  ;;  %v1522_v25 = vpop.f32.mrb[3].mxu0 }
 0x135   : > { %v1565_v26 = vadd.f32 %v2026_v20, %v1865_v18  ;;  %v2028_v27 = vadd.f32 %v1522_v25, %v710_v14 }
 0x136   : > { %vm1575_vm5 = vcmp.gt.f32.partialorder %v1567_v22, 0.0  ;;  %v1583_v28 = vmul.f32 0.2, %v1567_v22  ;;  %v1568_v29 = vadd.f32 %v2027_v24, %v1865_v18 }
 0x137   : > { %vm1573_vm6 = vcmp.gt.f32.partialorder %v1565_v26, 0.0  ;;  %v1581_v30 = vmul.f32 0.2, %v1565_v26  ;;  %v1566_v31 = vadd.f32 %v2028_v27, %v1865_v18 }
 0x138   : > { %v1591_v32 = vsel %vm1575_vm5, %v1567_v22, %v1583_v28  ;;  %vm1576_vm8 = vcmp.gt.f32.partialorder %v1568_v29, 0.0  ;;  %v1584_v1 = vmul.f32 0.2, %v1568_v29 }
 0x139   : > { %v1881_v33 = vpack.c.bf16 %v1591_v32, %v1591_v32  ;;  %v1589_v34 = vsel %vm1573_vm6, %v1565_v26, %v1581_v30  ;;  %vm1574_vm9 = vcmp.gt.f32.partialorder %v1566_v31, 0.0  ;;  %v1582_v35 = vmul.f32 0.2, %v1566_v31  ;;  %v2021_v39 = vpop.f32.mrb[4].mxu0  ;;  %v1981_v41 = vpop.f32.mrb[4].mxu1 }
 0x13a   : > { %v1879_v36 = vpack.c.bf16 %v1589_v34, %v1589_v34  ;;  %v1592_v3 = vsel %vm1576_vm8, %v1568_v29, %v1584_v1  ;;  %v1535_v40 = vpop.f32.mrb[5].mxu0  ;;  %v2029_v43 = vadd.f32 %v2021_v39, %v1981_v41  ;;  %v841_v45 = vpop.f32.mrb[5].mxu1 }
 0x13b   : > { %1632 = vst.msk [vmem:[%s2547_s6 + $0x8] sm:$0xf] %vm1629_vm7, %v1881_v33  ;;  %v1882_v37 = vpack.c.bf16 %v1592_v3, %v1592_v3  ;;  %v1590_v38 = vsel %vm1574_vm9, %v1566_v31, %v1582_v35  ;;  %v2022_v42 = vpop.f32.mrb[6].mxu0  ;;  %v2030_v46 = vadd.f32 %v1535_v40, %v841_v45  ;;  %v1982_v15 = vpop.f32.mrb[6].mxu1 }
 0x13c   : > { %1630 = vst.msk [vmem:[%s2547_s6] sm:$0xf] %vm1629_vm7, %v1879_v36  ;;  %v1880_v16 = vpack.c.bf16 %v1590_v38, %v1590_v38  ;;  %v1538_v23 = vpop.f32.mrb[7].mxu0  ;;  %v1571_v47 = vadd.f32 %v2029_v43, %v1865_v18  ;;  %v2031_v48 = vadd.f32 %v2022_v42, %v1982_v15  ;;  %v844_v49 = vpop.f32.mrb[7].mxu1 }
 0x13d   : > { %1633 = vst.msk [vmem:[%s2547_s6 + $0xc] sm:$0xf] %vm1629_vm7, %v1882_v37  ;;  %v1569_v10 = vadd.f32 %v2030_v46, %v1865_v18  ;;  %v2032_v50 = vadd.f32 %v1538_v23, %v844_v49 }
 0x13e   : > { %1631 = vst.msk [vmem:[%s2547_s6 + $0x4] sm:$0xf] %vm1629_vm7, %v1880_v16  ;;  %vm1579_vm10 = vcmp.gt.f32.partialorder %v1571_v47, 0.0  ;;  %v1587_v51 = vmul.f32 0.2, %v1571_v47  ;;  %v1572_v52 = vadd.f32 %v2031_v48, %v1865_v18 }
 0x13f   : > { %vm1577_vm11 = vcmp.gt.f32.partialorder %v1569_v10, 0.0  ;;  %v1585_v53 = vmul.f32 0.2, %v1569_v10  ;;  %v1570_v54 = vadd.f32 %v2032_v50, %v1865_v18 }
 0x140   : > { %v1595_v55 = vsel %vm1579_vm10, %v1571_v47, %v1587_v51  ;;  %vm1580_vm12 = vcmp.gt.f32.partialorder %v1572_v52, 0.0  ;;  %v1588_v56 = vmul.f32 0.2, %v1572_v52 }
 0x141   : > { %v1885_v57 = vpack.c.bf16 %v1595_v55, %v1595_v55  ;;  %v1593_v58 = vsel %vm1577_vm11, %v1569_v10, %v1585_v53  ;;  %vm1578_vm13 = vcmp.gt.f32.partialorder %v1570_v54, 0.0  ;;  %v1586_v59 = vmul.f32 0.2, %v1570_v54 }
 0x142   : > { %v1883_v60 = vpack.c.bf16 %v1593_v58, %v1593_v58  ;;  %v1596_v61 = vsel %vm1580_vm12, %v1572_v52, %v1588_v56 }
 0x143   : > { %1636 = vst.msk [vmem:[%s2547_s6 + $0x18] sm:$0xf] %vm1629_vm7, %v1885_v57  ;;  %v1886_v62 = vpack.c.bf16 %v1596_v61, %v1596_v61  ;;  %v1594_v63 = vsel %vm1578_vm13, %v1570_v54, %v1586_v59 }
 0x144   : > { %1634 = vst.msk [vmem:[%s2547_s6 + $0x10] sm:$0xf] %vm1629_vm7, %v1883_v60  ;;  %v1884_v0 = vpack.c.bf16 %v1594_v63, %v1594_v63 }
 0x145   : > { %1637 = vst.msk [vmem:[%s2547_s6 + $0x1c] sm:$0xf] %vm1629_vm7, %v1886_v62 }
 0x146   : > { %1635 = vst.msk [vmem:[%s2547_s6 + $0x14] sm:$0xf] %vm1629_vm7, %v1884_v0 }
 0x147   : > { %2178 = shalt.err (!%p2175_p3)
}
 0x148   : > { %s2179_s25 = scalar_lea.hbm %s2564_s11, 512  ;;  %s2183_s28 = scalar_lea.hbm %s2620_s3, 1024 }
 0x149   : > { %p2180_p4 = scmp.ne.s32.totalorder %s2564_s11, %s2179_s25  ;;  %p2184_p9 = scmp.lt.u32.totalorder %s2564_s11, %s2620_s3 }
 0x14a   : > { %p2185_p10 = scmp.lt.u32.totalorder %s2183_s28, %s2179_s25  ;;  %p2187_p12 = scmp.lt.u32.totalorder %s2179_s25, %s2564_s11 }
 0x14b   : > { %p2181_p7 = pnand %p2180_p4, %p2290_p5 }
 0x14c   : > { %p2186_p11 = por %p2185_p10, %p2184_p9 }
 0x14d   : > { %p2182_p8 = pneg %p2181_p7 }
 0x14e   : > { %p2188_p13 = por %p2187_p12, %p2186_p11 }
 0x150   : > { %p2189_p0 = pnand %p2188_p13, %p2182_p8 }
 0x152   : > { %2192 = shalt.err (!%p2189_p0)
}
 0x153   : > { %s2230_s4 = smov 64   ;;  %s2231_s5 = smov 4  }
 0x154   : > { %2100 = dma.vmem_to_hbm [thread:$0]  (%p2290_p5), %s2566_s8, 512, %s2564_s11, %s2576_s16, %s2230_s4, %s2230_s4, %s2231_s5  }
 0x155 PF: > { %p2106_p1 = scmp.ge.s32.totalorder %s2227_s15, 2  ;;  %s1667_s6 = sand.u32 1, %s2215_s12  }
 0x156   : > { %s1668_s7 = scalar_lea.sflag [#allocation3], %s1667_s6 }
 0x157   : > { %p2103_p2 = pnand %p2106_p1, %p2294_p6 }
 0x159   : > { %2210 = dma.done.wait (!%p2103_p2), %s1668_s7, 512  }
 0x15a   : > { %2212 = vsyncadd (!%p2103_p2), %s1668_s7, 4294966784  ;;  %p13_p3 = scmp.ge.s32.totalorder %s2277_s18, 4   ;;  %s2625_s12 = smov %s2219_s13 }
 0x15b   : > { %s2626_s13 = smov %s2223_s14  ;;  %s2627_s14 = smov %s2288_s21 }
 0x15c   : > { %s2628_s15 = smov %s2277_s18  ;;  %15 = sbr.rel (!%p13_p3) target bundleno = 3 (0x3), region = 72 }
 0x163   :  { %1673 = vsyncpa [#allocation3], 1 }
 0x164   :  { %1675 = vsyncpa [#allocation3 + $0x1], 1 }

</bundles_post_ra>
